<compile_context>
chip_gen: v6e
topology: v6e:2x2x1
jax: 0.10.0
libtpu: 0.0.40
codegen_flags: <defaults>
</compile_context>

<pallas_src>
import math
from functools import partial

import jax
import jax.numpy as jnp
from jax.experimental import pallas as pl
from jax.experimental.pallas import tpu as pltpu


def _round_up(n, m):
    return ((n + m - 1) // m) * m


def _gelu_tanh(x):
    # PyTorch nn.GELU(approximate='tanh'):
    #   0.5 * x * (1 + tanh(sqrt(2/pi) * (x + 0.044715 * x^3)))
    c = math.sqrt(2.0 / math.pi)
    return 0.5 * x * (1.0 + jnp.tanh(c * (x + 0.044715 * x * x * x)))


def _choose_inner(th_block, requested=None):
    """Width of the in-kernel hidden sub-chunk (bounds (tm, th) temporaries)."""
    if (requested is not None and requested % 128 == 0
            and 0 < requested <= th_block and th_block % requested == 0):
        return requested
    for cand in (512, 384, 256, 128):
        if cand <= th_block and th_block % cand == 0:
            return cand
    return th_block


def _choose_hidden_tile(H, th_req):
    """Streamed hidden-chunk width: a multiple of 128 (preferably 256) that
    divides H, never below 256 (keeps >=512B DMA runs); pads H if needed."""
    th_req = max(256, (th_req // 128) * 128)
    lo = min(th_req, H)
    for cand in range(lo, 255, -128):          # prefer multiples of 256
        if cand % 256 == 0 and H % cand == 0:
            return cand, H
    for cand in range(lo, 127, -128):          # any multiple of 128 dividing H
        if H % cand == 0:
            return cand, H
    th = max(256, min(th_req, 512))            # no divisor: pad H
    return th, _round_up(H, th)


def mlp_kernel(x_ref, w1_ref, b1_ref, w2_ref, b2_ref, o_ref, acc_ref, *,
               th_inner, n_inner, compute_dtype, gelu_dtype):
    # x_ref : (tm, D)        input dtype (resident across the h axis)
    # w1_ref: (D, th_blk)    compute dtype (c_fc weight block)
    # b1_ref: (1, th_blk)    f32
    # w2_ref: (th_blk, D)    compute dtype (c_proj weight block)
    # b2_ref: (1, D)         f32
    # o_ref : (tm, D)        out dtype (resident across the h axis)
    # acc_ref: (tm, D)       f32 accumulator scratch
    hj = pl.program_id(1)

    @pl.when(hj == 0)
    def _init():
        # Fold the c_proj bias into the accumulator once per row tile.
        acc_ref[...] = jnp.broadcast_to(
            b2_ref[...].astype(jnp.float32), acc_ref.shape)

    # Cast to the MXU compute dtype in-kernel (avoids a wrapper-side HBM pass).
    x = x_ref[...].astype(compute_dtype)

    def sub_step(lo):
        # (tm, D) @ (D, th_inner) -> f32, + bias, GELU, then accumulate the
        # second matmul into the f32 scratch.
        h = jnp.dot(x, w1_ref[:, pl.ds(lo, th_inner)],
                    preferred_element_type=jnp.float32)
        h = h + b1_ref[:, pl.ds(lo, th_inner)]
        g = _gelu_tanh(h.astype(gelu_dtype)).astype(compute_dtype)
        acc_ref[...] += jnp.dot(g, w2_ref[pl.ds(lo, th_inner), :],
                                preferred_element_type=jnp.float32)

    # Sub-chunk the hidden dim inside the block so the (tm, th) temporaries
    # stay bounded (<= tm x 512) even with resident weights / large tm.
    if n_inner <= 8:
        for s in range(n_inner):               # static offsets, short unroll
            sub_step(s * th_inner)
    else:
        def body(s, carry):
            sub_step(pl.multiple_of(s * th_inner, th_inner))
            return carry
        jax.lax.fori_loop(0, n_inner, body, 0)

    @pl.when(hj == pl.num_programs(1) - 1)
    def _finalize():
        o_ref[...] = acc_ref[...].astype(o_ref.dtype)


@partial(jax.jit, static_argnames=("tm", "th", "th_inner", "compute_dtype",
                                   "out_dtype", "gelu_dtype", "vmem_budget_mib"))
def mlp_forward(x, w_fc, b_fc, w_proj, b_proj, *, tm=None, th=512,
                th_inner=None, compute_dtype=jnp.bfloat16, out_dtype=None,
                gelu_dtype=jnp.float32, vmem_budget_mib=46):
    """x: (B, T, D). w_fc: (D, H), b_fc: (H,), w_proj: (H, D), b_proj: (D,).

    Weights are stored (in_features, out_features): the kernel computes
    x @ W + b, matching PyTorch's x @ W^T with its (out, in) storage.
    Set out_dtype=jnp.bfloat16 to halve output writeback traffic.
    """
    B, T, D = x.shape
    H = w_fc.shape[1]
    M = B * T
    out_dtype = x.dtype if out_dtype is None else out_dtype

    cbytes = jnp.dtype(compute_dtype).itemsize
    xbytes = jnp.dtype(x.dtype).itemsize
    obytes = jnp.dtype(out_dtype).itemsize
    budget = int(vmem_budget_mib) * (1 << 20)

    def est_vmem(tm_, th_blk, th_in):
        w = 2 * 2 * D * th_blk * cbytes             # w1 + w2, double-buffered
        b = 2 * (th_blk + D) * 4                    # biases (f32), dbl-buffered
        xv = 2 * tm_ * D * xbytes                   # x tile, dbl-buffered
        ov = 2 * tm_ * D * obytes                   # out tile, dbl-buffered
        acc = tm_ * D * 4                           # f32 accumulator scratch
        tmp = 2 * tm_ * th_in * (4 + cbytes)        # h (f32) + g temporaries
        return w + b + xv + ov + acc + tmp

    # ---- plan: resident weights (preferred) vs streamed hidden chunks ------
    m_cap = _round_up(M, 16)                        # bf16 sublane packing = 16
    tm_res = min(_round_up(256 if tm is None else tm, 16), m_cap)
    ti_res = _choose_inner(H, th_inner)
    resident = est_vmem(tm_res, H, ti_res) <= budget

    if resident:
        tm_eff, th_eff, H_pad, ti_eff = tm_res, H, H, ti_res
    else:
        # Streaming: bigger row tile amortizes weight re-fetch & step overhead.
        tm_eff = min(_round_up(512 if tm is None else tm, 16), m_cap)
        th_eff, H_pad = _choose_hidden_tile(H, th)
        ti_eff = _choose_inner(th_eff, th_inner)
    n_inner = th_eff // ti_eff

    M_pad = _round_up(M, tm_eff)
    n_i = M_pad // tm_eff                           # for large M this is even,
    n_h = H_pad // th_eff                           # keeping both v7x TCs busy

    # ---- prepare operands (reshape is free; pad only when required) --------
    x2d = x.reshape(M, D)
    if M_pad != M:
        x2d = jnp.pad(x2d, ((0, M_pad - M), (0, 0)))

    w1 = w_fc.astype(compute_dtype)
    w2 = w_proj.astype(compute_dtype)
    b1 = b_fc.reshape(1, H).astype(jnp.float32)
    b2 = b_proj.reshape(1, D).astype(jnp.float32)
    if H_pad != H:
        # Zero-padded hidden columns give GELU(0)=0 -> contribute nothing.
        w1 = jnp.pad(w1, ((0, 0), (0, H_pad - H)))
        w2 = jnp.pad(w2, ((0, H_pad - H), (0, 0)))
        b1 = jnp.pad(b1, ((0, 0), (0, H_pad - H)))

    # ---- cost estimate & VMEM limit -----------------------------------------
    weight_passes = 1 if n_h == 1 else n_i          # resident -> fetched once
    cost = pl.CostEstimate(
        flops=4 * M_pad * D * H_pad,
        transcendentals=M_pad * H_pad,
        bytes_accessed=(M_pad * D * xbytes + M_pad * D * obytes
                        + weight_passes * 2 * D * H_pad * cbytes
                        + (H_pad + D) * 4))
    est = est_vmem(tm_eff, th_eff, ti_eff)
    vmem_limit = int(min(max(est * 1.3, 33 << 20), 61 << 20))

    kernel = partial(mlp_kernel, th_inner=ti_eff, n_inner=n_inner,
                     compute_dtype=compute_dtype, gelu_dtype=gelu_dtype)

    out2d = pl.pallas_call(
        kernel,
        out_shape=jax.ShapeDtypeStruct((M_pad, D), out_dtype),
        grid_spec=pltpu.PrefetchScalarGridSpec(
            num_scalar_prefetch=0,
            grid=(n_i, n_h),
            in_specs=[
                pl.BlockSpec((tm_eff, D), lambda i, h: (i, 0)),    # x tile
                pl.BlockSpec((D, th_eff), lambda i, h: (0, h)),    # W_fc block
                pl.BlockSpec((1, th_eff), lambda i, h: (0, h)),    # b_fc block
                pl.BlockSpec((th_eff, D), lambda i, h: (h, 0)),    # W_proj blk
                pl.BlockSpec((1, D), lambda i, h: (0, 0)),         # b_proj
            ],
            out_specs=pl.BlockSpec((tm_eff, D), lambda i, h: (i, 0)),
            scratch_shapes=[pltpu.VMEM((tm_eff, D), jnp.float32)],
        ),
        compiler_params=pltpu.CompilerParams(
            dimension_semantics=("parallel", "arbitrary"),
            vmem_limit_bytes=vmem_limit),
        cost_estimate=cost,
    )(x2d, w1, b1, w2, b2)

    if M_pad != M:
        out2d = out2d[:M]
    return out2d.reshape(B, T, D)


def mlp_reference(x, w_fc, b_fc, w_proj, b_proj):
    h = jnp.einsum("btd,dh->bth", x, w_fc) + b_fc
    g = _gelu_tanh(h)
    return jnp.einsum("bth,hd->btd", g, w_proj) + b_proj


if __name__ == "__main__":
    # Small shapes consistent with the module: n_embd -> 4*n_embd -> n_embd.
    B, T, D = 2, 8, 128
    H = 4 * D

    key = jax.random.PRNGKey(0)
    kx, k1, k2, k3, k4 = jax.random.split(key, 5)

    x = jax.random.normal(kx, (B, T, D), dtype=jnp.float32)

    # Deterministic init mimicking nn.Linear's uniform(-1/sqrt(fan_in), ...),
    # stored (in_features, out_features) for the kernel's x @ W convention.
    bound_fc = 1.0 / math.sqrt(D)
    w_fc = jax.random.uniform(k1, (D, H), jnp.float32, -bound_fc, bound_fc)
    b_fc = jax.random.uniform(k2, (H,), jnp.float32, -bound_fc, bound_fc)

    bound_pj = 1.0 / math.sqrt(H)
    w_proj = jax.random.uniform(k3, (H, D), jnp.float32, -bound_pj, bound_pj)
    b_proj = jax.random.uniform(k4, (D,), jnp.float32, -bound_pj, bound_pj)

    ref = mlp_reference(x, w_fc, b_fc, w_proj, b_proj)

    # 1) Default plan: resident weights (single weight fetch, single h step).
    out = jax.block_until_ready(mlp_forward(x, w_fc, b_fc, w_proj, b_proj))
    assert out.shape == (B, T, D)
    assert jnp.allclose(out, ref, atol=3e-2, rtol=3e-2), "resident mismatch"

    # 2) Resident weights with in-kernel hidden sub-chunking (n_inner = 2).
    out2 = jax.block_until_ready(
        mlp_forward(x, w_fc, b_fc, w_proj, b_proj, th_inner=256))
    assert jnp.allclose(out2, ref, atol=3e-2, rtol=3e-2), "sub-chunk mismatch"

    # 3) Forced streaming path: multiple row tiles and hidden chunks
    #    (vmem_budget_mib=0 disables residency to exercise the accumulator).
    x3 = jax.random.normal(kx, (2, 32, D), dtype=jnp.float32)
    ref3 = mlp_reference(x3, w_fc, b_fc, w_proj, b_proj)
    out3 = jax.block_until_ready(
        mlp_forward(x3, w_fc, b_fc, w_proj, b_proj,
                    tm=16, th=256, vmem_budget_mib=0))
    assert jnp.allclose(out3, ref3, atol=3e-2, rtol=3e-2), "streaming mismatch"

    print("KERNEL_OK")
</pallas_src>

<mosaic_0001>
module attributes {stable_mosaic.version = 11 : i64} {
  func.func @mlp_kernel(%arg0: i32, %arg1: i32, %arg2: memref<16x128xf32, #tpu.memory_space<vmem>>, %arg3: memref<128x512xbf16, #tpu.memory_space<vmem>>, %arg4: memref<1x512xf32, #tpu.memory_space<vmem>>, %arg5: memref<512x128xbf16, #tpu.memory_space<vmem>>, %arg6: memref<1x128xf32, #tpu.memory_space<vmem>>, %arg7: memref<16x128xf32, #tpu.memory_space<vmem>>, %arg8: memref<16x128xf32, #tpu.memory_space<vmem>>) attributes {dimension_semantics = [#tpu.dimension_semantics<parallel>, #tpu.dimension_semantics<arbitrary>], iteration_bounds = array<i64: 1, 1>, scalar_prefetch = 0 : i64, scratch_operands = 1 : i64, tpu.core_type = #tpu.core_type<tc>, window_params = [{transform_indices = @transform_0, window_bounds = array<i64: 16, 128>}, {transform_indices = @transform_1, window_bounds = array<i64: 128, 512>}, {transform_indices = @transform_2, window_bounds = array<i64: 1, 512>}, {transform_indices = @transform_3, window_bounds = array<i64: 512, 128>}, {pipeline_mode = #tpu.pipeline_mode<synchronous>, transform_indices = @transform_4, window_bounds = array<i64: 1, 128>}, {transform_indices = @transform_5, window_bounds = array<i64: 16, 128>}]} {
    %c0_i32 = arith.constant 0 : i32
    %0 = arith.cmpi eq, %arg1, %c0_i32 : i32
    %1 = arith.extui %0 : i1 to i32
    %c0_i32_0 = arith.constant 0 : i32
    %2 = arith.cmpi ne, %1, %c0_i32_0 : i32
    scf.if %2 {
      %c0_19 = arith.constant 0 : index
      %c0_20 = arith.constant 0 : index
      %32 = vector.load %arg6[%c0_19, %c0_20] : memref<1x128xf32, #tpu.memory_space<vmem>>, vector<1x128xf32>
      %33 = vector.shape_cast %32 : vector<1x128xf32> to vector<1x128xf32>
      %34 = vector.broadcast %33 : vector<1x128xf32> to vector<16x128xf32>
      %c0_21 = arith.constant 0 : index
      %c0_22 = arith.constant 0 : index
      %35 = vector.load %arg8[%c0_21, %c0_22] : memref<16x128xf32, #tpu.memory_space<vmem>>, vector<16x128xf32>
      tpu.vector_store %arg8[%c0_21, %c0_22], %34 {strides = array<i32>} : memref<16x128xf32, #tpu.memory_space<vmem>>, vector<16x128xf32>,
    } else {
    }
    %c0 = arith.constant 0 : index
    %c0_1 = arith.constant 0 : index
    %3 = vector.load %arg2[%c0, %c0_1] : memref<16x128xf32, #tpu.memory_space<vmem>>, vector<16x128xf32>
    %4 = arith.truncf %3 : vector<16x128xf32> to vector<16x128xbf16>
    %c0_2 = arith.constant 0 : index
    %c0_3 = arith.constant 0 : index
    %5 = vector.load %arg3[%c0_2, %c0_3] : memref<128x512xbf16, #tpu.memory_space<vmem>>, vector<128x512xbf16>
    %cst = arith.constant dense<0.000000e+00> : vector<16x512xf32>
    %6 = tpu.matmul %4, %5, %cst {dimension_numbers = #tpu.dot_dimension_numbers<[1], [0], [0], [1], [0, 0, 1, 1], [], []>} : vector<16x128xbf16>, vector<128x512xbf16>, vector<16x512xf32> -> vector<16x512xf32>
    %c0_4 = arith.constant 0 : index
    %c0_5 = arith.constant 0 : index
    %7 = vector.load %arg4[%c0_4, %c0_5] : memref<1x512xf32, #tpu.memory_space<vmem>>, vector<1x512xf32>
    %8 = vector.broadcast %7 : vector<1x512xf32> to vector<16x512xf32>
    %9 = arith.addf %6, %8 : vector<16x512xf32>
    %cst_6 = arith.constant 5.000000e-01 : f32
    %10 = vector.broadcast %cst_6 : f32 to vector<16x512xf32>
    %11 = arith.mulf %10, %9 : vector<16x512xf32>
    %cst_7 = arith.constant 4.471500e-02 : f32
    %12 = vector.broadcast %cst_7 : f32 to vector<16x512xf32>
    %13 = arith.mulf %12, %9 : vector<16x512xf32>
    %14 = arith.mulf %13, %9 : vector<16x512xf32>
    %15 = arith.mulf %14, %9 : vector<16x512xf32>
    %16 = arith.addf %9, %15 : vector<16x512xf32>
    %cst_8 = arith.constant 0.797884583 : f32
    %17 = vector.broadcast %cst_8 : f32 to vector<16x512xf32>
    %18 = arith.mulf %17, %16 : vector<16x512xf32>
    %19 = math.tanh %18 : vector<16x512xf32>
    %cst_9 = arith.constant 1.000000e+00 : f32
    %20 = vector.broadcast %cst_9 : f32 to vector<16x512xf32>
    %21 = arith.addf %20, %19 : vector<16x512xf32>
    %22 = arith.mulf %11, %21 : vector<16x512xf32>
    %23 = arith.truncf %22 : vector<16x512xf32> to vector<16x512xbf16>
    %c0_10 = arith.constant 0 : index
    %c0_11 = arith.constant 0 : index
    %24 = vector.load %arg8[%c0_10, %c0_11] : memref<16x128xf32, #tpu.memory_space<vmem>>, vector<16x128xf32>
    %c0_12 = arith.constant 0 : index
    %c0_13 = arith.constant 0 : index
    %25 = vector.load %arg5[%c0_12, %c0_13] : memref<512x128xbf16, #tpu.memory_space<vmem>>, vector<512x128xbf16>
    %cst_14 = arith.constant dense<0.000000e+00> : vector<16x128xf32>
    %26 = tpu.matmul %23, %25, %cst_14 {dimension_numbers = #tpu.dot_dimension_numbers<[1], [0], [0], [1], [0, 0, 1, 1], [], []>} : vector<16x512xbf16>, vector<512x128xbf16>, vector<16x128xf32> -> vector<16x128xf32>
    %27 = arith.addf %24, %26 : vector<16x128xf32>
    %c0_15 = arith.constant 0 : index
    %c0_16 = arith.constant 0 : index
    %28 = vector.load %arg8[%c0_15, %c0_16] : memref<16x128xf32, #tpu.memory_space<vmem>>, vector<16x128xf32>
    tpu.vector_store %arg8[%c0_15, %c0_16], %27 {strides = array<i32>} : memref<16x128xf32, #tpu.memory_space<vmem>>, vector<16x128xf32>,
    %c0_i32_17 = arith.constant 0 : i32
    %29 = arith.cmpi eq, %arg1, %c0_i32_17 : i32
    %30 = arith.extui %29 : i1 to i32
    %c0_i32_18 = arith.constant 0 : i32
    %31 = arith.cmpi ne, %30, %c0_i32_18 : i32
    scf.if %31 {
      %c0_19 = arith.constant 0 : index
      %c0_20 = arith.constant 0 : index
      %32 = vector.load %arg8[%c0_19, %c0_20] : memref<16x128xf32, #tpu.memory_space<vmem>>, vector<16x128xf32>
      %c0_21 = arith.constant 0 : index
      %c0_22 = arith.constant 0 : index
      %33 = vector.load %arg7[%c0_21, %c0_22] : memref<16x128xf32, #tpu.memory_space<vmem>>, vector<16x128xf32>
      tpu.vector_store %arg7[%c0_21, %c0_22], %32 {strides = array<i32>} : memref<16x128xf32, #tpu.memory_space<vmem>>, vector<16x128xf32>,
    } else {
    }
    return
  }
  func.func @transform_0(%arg0: i32, %arg1: i32) -> (i32, i32) {
    %c0_i32 = arith.constant 0 : i32
    %c0_i32_0 = arith.constant 0 : i32
    return %arg0, %c0_i32 : i32, i32
  }
  func.func @transform_1(%arg0: i32, %arg1: i32) -> (i32, i32) {
    %c0_i32 = arith.constant 0 : i32
    %c0_i32_0 = arith.constant 0 : i32
    return %c0_i32, %arg1 : i32, i32
  }
  func.func @transform_2(%arg0: i32, %arg1: i32) -> (i32, i32) {
    %c0_i32 = arith.constant 0 : i32
    %c0_i32_0 = arith.constant 0 : i32
    return %c0_i32, %arg1 : i32, i32
  }
  func.func @transform_3(%arg0: i32, %arg1: i32) -> (i32, i32) {
    %c0_i32 = arith.constant 0 : i32
    %c0_i32_0 = arith.constant 0 : i32
    return %arg1, %c0_i32 : i32, i32
  }
  func.func @transform_4(%arg0: i32, %arg1: i32) -> (i32, i32) {
    %c0_i32 = arith.constant 0 : i32
    %c0_i32_0 = arith.constant 0 : i32
    %c0_i32_1 = arith.constant 0 : i32
    return %c0_i32, %c0_i32_0 : i32, i32
  }
  func.func @transform_5(%arg0: i32, %arg1: i32) -> (i32, i32) {
    %c0_i32 = arith.constant 0 : i32
    %c0_i32_0 = arith.constant 0 : i32
    return %arg0, %c0_i32 : i32, i32
  }
}

</mosaic_0001>

<bundles_post_ra>
// kernel: mlp_forward.1
= control target key start
LH: loop header
LB: loop body
LE: loop exit
PB: predicated region body
PF: predicated region fallthrough
CT: control target
= control target key end

     0   :  { %v1012_v2 = vmov 0   ;;  %s1281_s0 = inlined_call_operand.vmem [shape: f32[16,128], index: 0, kind: input, shape index: {}]   ;;  %s1282_s1 = inlined_call_operand.vmem [shape: bf16[128,512], index: 1, kind: input, shape index: {}]   ;;  %s1283_s2 = inlined_call_operand.vmem [shape: f32[1,512], index: 2, kind: input, shape index: {}]   ;;  %s1284_s3 = inlined_call_operand.vmem [shape: bf16[512,128], index: 3, kind: input, shape index: {}]   ;;  %s1285_s4 = inlined_call_operand.vmem [shape: f32[1,128], index: 4, kind: input, shape index: {}]   ;;  %s1286_s5 = inlined_call_operand.hbm [shape: f32[16,128], index: 5, kind: output, shape index: {}]  }
   0x1   :  { %v894_v0 = vld [vmem:[%s1282_s1 + $0xe4] ss:$16 sps:$4 sm:$0xff]   ;;  %v896_v1 = vld [vmem:[%s1282_s1 + $0xec] ss:$16 sps:$4 sm:$0xff]   ;;  %284 = vmatprep.mubr.bf16.mxu0 %v1012_v2  ;;  %327 = vmatprep.mubr.bf16.mxu1 %v1012_v2  ;;  %v898_v3 = vld [vmem:[%s1282_s1 + $0xe0] ss:$16 sps:$4 sm:$0xff]  }
   0x2   :  { %252 = vmatprep.subr.bf16.mxu0 %v894_v0  ;;  %v899_v4 = vld [vmem:[%s1282_s1 + $0xe8] ss:$16 sps:$4 sm:$0xff]   ;;  %295 = vmatprep.subr.bf16.mxu1 %v896_v1  ;;  %v900_v5 = vld [vmem:[%s1282_s1 + $0xc4] ss:$16 sps:$4 sm:$0xff]   ;;  %v902_v6 = vld [vmem:[%s1282_s1 + $0xcc] ss:$16 sps:$4 sm:$0xff]  }
   0x3   :  { %253 = vmatpush1.bf16.msra.mxu0 %v898_v3  ;;  %296 = vmatpush1.bf16.msra.mxu1 %v899_v4  ;;  %v904_v7 = vld [vmem:[%s1282_s1 + $0xc0] ss:$16 sps:$4 sm:$0xff]   ;;  %v905_v8 = vld [vmem:[%s1282_s1 + $0xc8] ss:$16 sps:$4 sm:$0xff]   ;;  %v906_v9 = vld [vmem:[%s1282_s1 + $0xa4] ss:$16 sps:$4 sm:$0xff]  }
   0x4   :  { %254 = vmatprep.subr.bf16.mxu0 %v900_v5  ;;  %297 = vmatprep.subr.bf16.mxu1 %v902_v6  ;;  %v908_v10 = vld [vmem:[%s1282_s1 + $0xac] ss:$16 sps:$4 sm:$0xff]   ;;  %v910_v11 = vld [vmem:[%s1282_s1 + $0xa0] ss:$16 sps:$4 sm:$0xff]   ;;  %v911_v12 = vld [vmem:[%s1282_s1 + $0xa8] ss:$16 sps:$4 sm:$0xff]  }
   0x5   :  { %v912_v13 = vld [vmem:[%s1282_s1 + $0x84] ss:$16 sps:$4 sm:$0xff]   ;;  %v914_v14 = vld [vmem:[%s1282_s1 + $0x8c] ss:$16 sps:$4 sm:$0xff]   ;;  %v916_v15 = vld [vmem:[%s1282_s1 + $0x80] ss:$16 sps:$4 sm:$0xff]  }
   0x6   :  { %v917_v16 = vld [vmem:[%s1282_s1 + $0x88] ss:$16 sps:$4 sm:$0xff]   ;;  %v918_v17 = vld [vmem:[%s1282_s1 + $0x64] ss:$16 sps:$4 sm:$0xff]   ;;  %v920_v18 = vld [vmem:[%s1282_s1 + $0x6c] ss:$16 sps:$4 sm:$0xff]  }
   0x7   :  { %255 = vmatpush1.bf16.msra.mxu0 %v904_v7  ;;  %298 = vmatpush1.bf16.msra.mxu1 %v905_v8  ;;  %v922_v19 = vld [vmem:[%s1282_s1 + $0x60] ss:$16 sps:$4 sm:$0xff]   ;;  %v923_v20 = vld [vmem:[%s1282_s1 + $0x68] ss:$16 sps:$4 sm:$0xff]   ;;  %v924_v21 = vld [vmem:[%s1282_s1 + $0x44] ss:$16 sps:$4 sm:$0xff]  }
   0x8   :  { %256 = vmatprep.subr.bf16.mxu0 %v906_v9  ;;  %299 = vmatprep.subr.bf16.mxu1 %v908_v10  ;;  %v926_v22 = vld [vmem:[%s1282_s1 + $0x4c] ss:$16 sps:$4 sm:$0xff]   ;;  %v928_v23 = vld [vmem:[%s1282_s1 + $0x40] ss:$16 sps:$4 sm:$0xff]   ;;  %v929_v24 = vld [vmem:[%s1282_s1 + $0x48] ss:$16 sps:$4 sm:$0xff]  }
   0x9   :  { %v930_v25 = vld [vmem:[%s1282_s1 + $0x24] ss:$16 sps:$4 sm:$0xff]   ;;  %v932_v26 = vld [vmem:[%s1282_s1 + $0x2c] ss:$16 sps:$4 sm:$0xff]   ;;  %v934_v27 = vld [vmem:[%s1282_s1 + $0x20] ss:$16 sps:$4 sm:$0xff]  }
   0xa   :  { %v935_v28 = vld [vmem:[%s1282_s1 + $0x28] ss:$16 sps:$4 sm:$0xff]   ;;  %v936_v29 = vld [vmem:[%s1282_s1 + $0x4] ss:$16 sps:$4 sm:$0xff]   ;;  %v938_v30 = vld [vmem:[%s1282_s1 + $0xc] ss:$16 sps:$4 sm:$0xff]  }
   0xb   :  { %257 = vmatpush1.bf16.msra.mxu0 %v910_v11  ;;  %300 = vmatpush1.bf16.msra.mxu1 %v911_v12  ;;  %v940_v31 = vld [vmem:[%s1282_s1] ss:$16 sps:$4 sm:$0xff]   ;;  %v941_v32 = vld [vmem:[%s1282_s1 + $0x8] ss:$16 sps:$4 sm:$0xff]  }
   0xc   :  { %258 = vmatprep.subr.bf16.mxu0 %v912_v13  ;;  %301 = vmatprep.subr.bf16.mxu1 %v914_v14  ;;  %v35_v33 = vld [vmem:[%s1281_s0] sm:$0xff]  ;;  %v36_v34 = vld [vmem:[%s1281_s0 + $0x8] sm:$0xff] }
   0xd   :  { %v37_v35 = vpack.c.bf16 %v36_v34, %v35_v33 }
   0xf   :  { %259 = vmatpush1.bf16.msra.mxu0 %v916_v15  ;;  %302 = vmatpush1.bf16.msra.mxu1 %v917_v16 }
  0x10   :  { %260 = vmatprep.subr.bf16.mxu0 %v918_v17  ;;  %303 = vmatprep.subr.bf16.mxu1 %v920_v18 }
  0x13   :  { %261 = vmatpush1.bf16.msra.mxu0 %v922_v19  ;;  %304 = vmatpush1.bf16.msra.mxu1 %v923_v20 }
  0x14   :  { %262 = vmatprep.subr.bf16.mxu0 %v924_v21  ;;  %305 = vmatprep.subr.bf16.mxu1 %v926_v22 }
  0x17   :  { %263 = vmatpush1.bf16.msra.mxu0 %v928_v23  ;;  %306 = vmatpush1.bf16.msra.mxu1 %v929_v24 }
  0x18   :  { %264 = vmatprep.subr.bf16.mxu0 %v930_v25  ;;  %307 = vmatprep.subr.bf16.mxu1 %v932_v26 }
  0x1b   :  { %265 = vmatpush1.bf16.msra.mxu0 %v934_v27  ;;  %308 = vmatpush1.bf16.msra.mxu1 %v935_v28 }
  0x1c   :  { %266 = vmatprep.subr.bf16.mxu0 %v936_v29  ;;  %309 = vmatprep.subr.bf16.mxu1 %v938_v30 }
  0x1f   :  { %267 = vmatpush1.bf16.msra.mxu0 %v940_v31  ;;  %310 = vmatpush1.bf16.msra.mxu1 %v941_v32 }
  0x22   :  { %285 = vmatmul.mubr.bf16.vlgmr.msra.gmra.mxu0 %v37_v35  ;;  %328 = vmatmul.mubr.bf16.vlgmr.msra.gmra.mxu1 %v37_v35 }
  0x23   :  { %10 = vsyncpa [#allocation4], 0  ;;  %v942_v36 = vld [vmem:[%s1284_s3 + $0x78] sm:$0xff]   ;;  %v946_v40 = vld [vmem:[%s1284_s3 + $0x70] sm:$0xff]   ;;  %v72_v4 = vlaneseq  ;;  %s1013_s21 = smov [#allocation3]  }
  0x24   :  { %v943_v37 = vld [vmem:[%s1284_s3 + $0xf8] sm:$0xff]   ;;  %846 = vmatprep.subr.bf16.mxu0 %v942_v36  ;;  %v947_v41 = vld [vmem:[%s1284_s3 + $0xf0] sm:$0xff]   ;;  %v950_v44 = vld [vmem:[%s1284_s3 + $0x68] sm:$0xff]   ;;  %s770_s22 = sshll.u32 %s1013_s21, 4  ;;  %s771_s22 = int_to_ptr.vmem [resolvable:$true] %s770_s22 }
  0x25   :  { %v944_v38 = vld [vmem:[%s1284_s3 + $0x38] sm:$0xff]   ;;  %868 = vmatprep.subr.bf16.mxu1 %v943_v37  ;;  %v948_v42 = vld [vmem:[%s1284_s3 + $0x30] sm:$0xff]   ;;  %v951_v45 = vld [vmem:[%s1284_s3 + $0xe8] sm:$0xff]   ;;  %v73_v5 = vshrl.u32 %v72_v4, 7  ;;  %s990_s23 = scalar_lea.vmem %s771_s22, 256  ;;  %p995_p1 = scmp.lt.s32.totalorder %s771_s22, %s771_s22 }
  0x26   :  { %v945_v39 = vld [vmem:[%s1284_s3 + $0xb8] sm:$0xff]   ;;  %847 = vmatpush3.bf16.msra.mxu0 %v944_v38  ;;  %v949_v43 = vld [vmem:[%s1284_s3 + $0xb0] sm:$0xff]   ;;  %v952_v46 = vld [vmem:[%s1284_s3 + $0x28] sm:$0xff]   ;;  %p991_p0 = scmp.ne.s32.totalorder %s771_s22, %s990_s23  ;;  %p996_p2 = scmp.lt.s32.totalorder %s990_s23, %s990_s23 }
  0x27   :  { %869 = vmatpush3.bf16.msra.mxu1 %v945_v39  ;;  %848 = vmatprep.subr.bf16.mxu0 %v946_v40  ;;  %v953_v47 = vld [vmem:[%s1284_s3 + $0xa8] sm:$0xff]   ;;  %v954_v48 = vld [vmem:[%s1284_s3 + $0x60] sm:$0xff]   ;;  %v958_v52 = vld [vmem:[%s1284_s3 + $0x58] sm:$0xff]   ;;  %v74_v6 = vsub.s32 0, %v73_v5  ;;  %v82_v7 = vsub.s32 2, %v73_v5  ;;  %v78_v9 = vsub.s32 1, %v73_v5 }
  0x28   :  { %870 = vmatprep.subr.bf16.mxu1 %v947_v41  ;;  %v955_v49 = vld [vmem:[%s1284_s3 + $0xe0] sm:$0xff]   ;;  %v959_v53 = vld [vmem:[%s1284_s3 + $0xd8] sm:$0xff]   ;;  %v962_v56 = vld [vmem:[%s1284_s3 + $0x50] sm:$0xff]   ;;  %v86_v10 = vsub.s32 3, %v73_v5  ;;  %p997_p3 = por %p996_p2, %p995_p1 }
  0x29   :  { %v956_v50 = vld [vmem:[%s1284_s3 + $0x20] sm:$0xff]   ;;  %v960_v54 = vld [vmem:[%s1284_s3 + $0x18] sm:$0xff]   ;;  %v963_v57 = vld [vmem:[%s1284_s3 + $0xd0] sm:$0xff]  }
  0x2a   :  { %849 = vmatpush3.bf16.msra.mxu0 %v948_v42  ;;  %v957_v51 = vld [vmem:[%s1284_s3 + $0xa0] sm:$0xff]   ;;  %v961_v55 = vld [vmem:[%s1284_s3 + $0x98] sm:$0xff]   ;;  %v964_v58 = vld [vmem:[%s1284_s3 + $0x10] sm:$0xff]   ;;  %p998_p4 = pnand %p997_p3, %p991_p0 }
  0x2b   :  { %871 = vmatpush3.bf16.msra.mxu1 %v949_v43  ;;  %850 = vmatprep.subr.bf16.mxu0 %v950_v44  ;;  %v965_v59 = vld [vmem:[%s1284_s3 + $0x90] sm:$0xff]   ;;  %v966_v60 = vld [vmem:[%s1284_s3 + $0x48] sm:$0xff]   ;;  %v970_v0 = vld [vmem:[%s1284_s3 + $0x40] sm:$0xff]  }
  0x2c   :  { %872 = vmatprep.subr.bf16.mxu1 %v951_v45  ;;  %v967_v61 = vld [vmem:[%s1284_s3 + $0xc8] sm:$0xff]   ;;  %v971_v1 = vld [vmem:[%s1284_s3 + $0xc0] sm:$0xff]  }
  0x2d   :  { %v968_v62 = vld [vmem:[%s1284_s3 + $0x8] sm:$0xff]   ;;  %v972_v2 = vld [vmem:[%s1284_s3] sm:$0xff]  }
  0x2e   :  { %851 = vmatpush3.bf16.msra.mxu0 %v952_v46  ;;  %v969_v63 = vld [vmem:[%s1284_s3 + $0x88] sm:$0xff]   ;;  %v973_v3 = vld [vmem:[%s1284_s3 + $0x80] sm:$0xff]  }
  0x2f   :  { %873 = vmatpush3.bf16.msra.mxu1 %v953_v47  ;;  %852 = vmatprep.subr.bf16.mxu0 %v954_v48  ;;  %v70_v8 = vld [vmem:[%s1283_s2] sm:$0xf] }
  0x30   :  { %874 = vmatprep.subr.bf16.mxu1 %v955_v49  ;;  %v75_v11 = vrot.slane %v70_v8, %v74_v6  ;;  %v83_v12 = vrot.slane %v70_v8, %v82_v7  ;;  %v79_v13 = vrot.slane %v70_v8, %v78_v9  ;;  %v87_v14 = vrot.slane %v70_v8, %v86_v10 }
  0x32   :  { %853 = vmatpush3.bf16.msra.mxu0 %v956_v50 }
  0x33   :  { %875 = vmatpush3.bf16.msra.mxu1 %v957_v51  ;;  %854 = vmatprep.subr.bf16.mxu0 %v958_v52 }
  0x34   :  { %876 = vmatprep.subr.bf16.mxu1 %v959_v53 }
  0x36   :  { %855 = vmatpush3.bf16.msra.mxu0 %v960_v54 }
  0x37   :  { %877 = vmatpush3.bf16.msra.mxu1 %v961_v55  ;;  %856 = vmatprep.subr.bf16.mxu0 %v962_v56 }
  0x38   :  { %878 = vmatprep.subr.bf16.mxu1 %v963_v57 }
  0x3a   :  { %857 = vmatpush3.bf16.msra.mxu0 %v964_v58 }
  0x3b   :  { %879 = vmatpush3.bf16.msra.mxu1 %v965_v59  ;;  %858 = vmatprep.subr.bf16.mxu0 %v966_v60 }
  0x3c   :  { %880 = vmatprep.subr.bf16.mxu1 %v967_v61 }
  0x3e   :  { %859 = vmatpush3.bf16.msra.mxu0 %v968_v62 }
  0x3f   :  { %881 = vmatpush3.bf16.msra.mxu1 %v969_v63  ;;  %860 = vmatprep.subr.bf16.mxu0 %v970_v0 }
  0x40   :  { %882 = vmatprep.subr.bf16.mxu1 %v971_v1 }
  0x42   :  { %861 = vmatpush3.bf16.msra.mxu0 %v972_v2 }
  0x43   :  { %883 = vmatpush3.bf16.msra.mxu1 %v973_v3 }
  0xe2   :  { %v286_v15 = vpop.f32.mrf.mxu0  ;;  %v329_v16 = vpop.f32.mrf.mxu1 }
  0xe3   :  { %v1247_v17 = vadd.f32 %v286_v15, %v75_v11  ;;  %v1249_v18 = vadd.f32 %v329_v16, %v83_v12 }
  0xe4   :  { %v288_v19 = vpop.f32.mrf.mxu0  ;;  %v331_v20 = vpop.f32.mrf.mxu1 }
  0xe5   :  { %v346_v21 = vmul.f32 0.044715, %v1247_v17  ;;  %v348_v22 = vmul.f32 0.044715, %v1249_v18  ;;  %v289_v23 = vadd.f32 %v288_v19, %v79_v13  ;;  %v1253_v24 = vadd.f32 %v331_v20, %v87_v14 }
  0xe6   :  { %v290_v25 = vpop.f32.mrf.mxu0  ;;  %v333_v26 = vpop.f32.mrf.mxu1  ;;  %v338_v15 = vmul.f32 0.5, %v1247_v17 }
  0xe7   :  { %v354_v27 = vmul.f32 %v346_v21, %v1247_v17  ;;  %v356_v28 = vmul.f32 %v348_v22, %v1249_v18  ;;  %v347_v29 = vmul.f32 0.044715, %v289_v23  ;;  %v349_v30 = vmul.f32 0.044715, %v1253_v24 }
  0xe8   :  { %v291_v31 = vadd.f32 %v290_v25, %v75_v11  ;;  %v1258_v32 = vadd.f32 %v333_v26, %v83_v12  ;;  %v292_v33 = vpop.f32.mrf.mxu0  ;;  %v335_v34 = vpop.f32.mrf.mxu1 }
  0xe9   :  { %v362_v35 = vmul.f32 %v354_v27, %v1247_v17  ;;  %v364_v36 = vmul.f32 %v356_v28, %v1249_v18  ;;  %v355_v37 = vmul.f32 %v347_v29, %v289_v23  ;;  %v357_v38 = vmul.f32 %v349_v30, %v1253_v24 }
  0xea   :  { %v350_v39 = vmul.f32 0.044715, %v291_v31  ;;  %v352_v40 = vmul.f32 0.044715, %v1258_v32  ;;  %v293_v41 = vadd.f32 %v292_v33, %v79_v13  ;;  %v336_v42 = vadd.f32 %v335_v34, %v87_v14 }
  0xeb   :  { %v370_v43 = vadd.f32 %v362_v35, %v1247_v17  ;;  %v372_v44 = vadd.f32 %v364_v36, %v1249_v18  ;;  %v363_v45 = vmul.f32 %v355_v37, %v289_v23  ;;  %v365_v46 = vmul.f32 %v357_v38, %v1253_v24 }
  0xec   :  { %v358_v47 = vmul.f32 %v350_v39, %v291_v31  ;;  %v360_v48 = vmul.f32 %v352_v40, %v1258_v32  ;;  %v351_v49 = vmul.f32 0.044715, %v293_v41  ;;  %v353_v50 = vmul.f32 0.044715, %v336_v42 }
  0xed   :  { %v378_v51 = vmul.f32 0.7978846, %v370_v43  ;;  %v380_v52 = vmul.f32 0.7978846, %v372_v44  ;;  %v371_v53 = vadd.f32 %v363_v45, %v289_v23  ;;  %v373_v59 = vadd.f32 %v365_v46, %v1253_v24 }
  0xee   :  { %v366_v54 = vmul.f32 %v358_v47, %v291_v31  ;;  %v368_v55 = vmul.f32 %v360_v48, %v1258_v32  ;;  %v359_v56 = vmul.f32 %v351_v49, %v293_v41  ;;  %v361_v57 = vmul.f32 %v353_v50, %v336_v42  ;;  %v781_v50 = vld [vmem:[%s1285_s4] ss:$0 sm:$0xff] }
  0xef   :  { %v379_v58 = vmul.f32 0.7978846, %v371_v53  ;;  %974 = vtanh.f32 %v378_v51  ;;  %v381_v0 = vmul.f32 0.7978846, %v373_v59  ;;  %v339_v13 = vmul.f32 0.5, %v289_v23 }
  0xf0   :  { %v374_v60 = vadd.f32 %v366_v54, %v291_v31  ;;  %v376_v61 = vadd.f32 %v368_v55, %v1258_v32  ;;  %v367_v62 = vmul.f32 %v359_v56, %v293_v41  ;;  %976 = vtanh.f32 %v380_v52 }
  0xf1   :  { %v369_v63 = vmul.f32 %v361_v57, %v336_v42  ;;  %978 = vtanh.f32 %v379_v58  ;;  %v342_v21 = vmul.f32 0.5, %v291_v31  ;;  %v343_v27 = vmul.f32 0.5, %v293_v41 }
  0xf2   :  { %v382_v1 = vmul.f32 0.7978846, %v374_v60  ;;  %v384_v2 = vmul.f32 0.7978846, %v376_v61  ;;  %v375_v3 = vadd.f32 %v367_v62, %v293_v41  ;;  %980 = vtanh.f32 %v381_v0 }
  0xf3   :  { %v377_v4 = vadd.f32 %v369_v63, %v336_v42  ;;  %v344_v29 = vmul.f32 0.5, %v1258_v32  ;;  %v341_v33 = vmul.f32 0.5, %v1253_v24  ;;  %v345_v34 = vmul.f32 0.5, %v336_v42 }
  0xf4   :  { %982 = vtanh.f32 %v382_v1  ;;  %v383_v5 = vmul.f32 0.7978846, %v375_v3  ;;  %v340_v17 = vmul.f32 0.5, %v1249_v18 }
  0xf5   :  { %984 = vtanh.f32 %v384_v2  ;;  %v385_v6 = vmul.f32 0.7978846, %v377_v4 }
  0xf6   :  { %986 = vtanh.f32 %v383_v5 }
  0xf7   :  { %988 = vtanh.f32 %v385_v6 }
  0xfc   :  { %v975_v7 = vpop.eup %974 }
  0xfd   :  { %v977_v8 = vpop.eup %976  ;;  %v394_v22 = vadd.f32 1.0, %v975_v7 }
  0xfe   :  { %v979_v9 = vpop.eup %978  ;;  %v396_v30 = vadd.f32 1.0, %v977_v8 }
  0xff   :  { %v981_v10 = vpop.eup %980  ;;  %v395_v14 = vadd.f32 1.0, %v979_v9  ;;  %v402_v40 = vmul.f32 %v394_v22, %v338_v15 }
 0x100   :  { %v397_v20 = vadd.f32 1.0, %v981_v10  ;;  %v404_v44 = vmul.f32 %v396_v30, %v340_v17 }
 0x101   :  { %v983_v11 = vpop.eup %982  ;;  %v403_v36 = vmul.f32 %v395_v14, %v339_v13 }
 0x102   :  { %v985_v12 = vpop.eup %984  ;;  %v398_v16 = vadd.f32 1.0, %v983_v11  ;;  %v405_v39 = vmul.f32 %v397_v20, %v341_v33 }
 0x103   :  { %v987_v19 = vpop.eup %986  ;;  %v400_v25 = vadd.f32 1.0, %v985_v12 }
 0x104   :  { %v989_v26 = vpop.eup %988  ;;  %v399_v28 = vadd.f32 1.0, %v987_v19  ;;  %v406_v23 = vmul.f32 %v398_v16, %v342_v21 }
 0x105   :  { %v401_v35 = vadd.f32 1.0, %v989_v26  ;;  %v408_v38 = vmul.f32 %v400_v25, %v344_v29 }
 0x106   :  { %v407_v37 = vmul.f32 %v399_v28, %v343_v27  ;;  %v410_v45 = vpack.c.bf16 %v406_v23, %v402_v40 }
 0x107   :  { %v409_v31 = vmul.f32 %v401_v35, %v345_v34  ;;  %v412_v32 = vpack.c.bf16 %v408_v38, %v404_v44 }
 0x108   :  { %v411_v43 = vpack.c.bf16 %v407_v37, %v403_v36 }
 0x109   :  { %v413_v41 = vpack.c.bf16 %v409_v31, %v405_v39 }
 0x10a   :  { %704 = vmatprep.mubr.bf16.mxu0 %v411_v43 }
 0x10b   :  { %745 = vmatprep.mubr.bf16.mxu1 %v413_v41  ;;  %705 = vmatmul.mubr.bf16.vlgmr.msra.gmra.mxu0 %v410_v45 }
 0x10c   :  { %746 = vmatmul.mubr.bf16.vlgmr.msra.gmra.mxu1 %v412_v32 }
 0x1cb   :  { %v862_v24 = vpop.f32.mrf.mxu0 }
 0x1cc   :  { %v884_v42 = vpop.f32.mrf.mxu1 }
 0x1cd   :  { %v863_v46 = vpop.f32.mrf.mxu0 }
 0x1ce   :  { %v864_v47 = vadd.f32 %v863_v46, %v862_v24  ;;  %v885_v48 = vpop.f32.mrf.mxu1 }
 0x1cf   :  { %v886_v49 = vadd.f32 %v885_v48, %v884_v42  ;;  %v865_v18 = vpop.f32.mrf.mxu0 }
 0x1d0   :  { %v887_v51 = vpop.f32.mrf.mxu1 }
 0x1d1   :  { %v748_v52 = vadd.f32 %v886_v49, %v864_v47  ;;  %v866_v53 = vpop.f32.mrf.mxu0 }
 0x1d2   :  { %v867_v54 = vadd.f32 %v866_v53, %v865_v18  ;;  %v888_v55 = vpop.f32.mrf.mxu1 }
 0x1d3   :  { %v754_v56 = vadd.f32 %v781_v50, %v748_v52  ;;  %v889_v57 = vadd.f32 %v888_v55, %v887_v51 }
 0x1d5   :  { %763 = vst [vmem:[#allocation3] sm:$0xff] %v754_v56  ;;  %v751_v58 = vadd.f32 %v889_v57, %v867_v54 }
 0x1d7   :  { %v755_v59 = vadd.f32 %v781_v50, %v751_v58 }
 0x1d9   :  { %764 = vst [vmem:[#allocation3 + $0x8] sm:$0xff] %v755_v59 }
 0x1da   :  { %1001 = shalt.err (!%p998_p4)
}
 0x1db   :  { %s1014_s4 = smov 128   ;;  %s1015_s24 = smov 8  }
 0x1dc   :  { %776 = dma.vmem_to_hbm [thread:$0]  %s771_s22, 256, %s1286_s5, [#allocation4], %s1014_s4, %s1014_s4, %s1015_s24  }
 0x1dd   :  { %1010 = dma.done.wait [#allocation4], 256  }
 0x1de   :  { %1011 = vsyncadd [#allocation4], 4294967040 }
 0x1df   :  { %780 = vsyncpa [#allocation4], 1 }

</bundles_post_ra>
